<compile_context>
chip_gen: v5e
topology: v5e:2x2
jax: 0.10.0
libtpu: 0.0.40
codegen_flags: <defaults>
</compile_context>

<pallas_src>
import functools
import math

import jax
import jax.numpy as jnp
from jax.experimental import pallas as pl
from jax.experimental.pallas import tpu as pltpu

BN_EPS = 1e-5
SIGMA_EPS = 1e-6
LANE = 128
ROW_TILE = 16            # bf16 sublane-packed tile height
MXU_DTYPE = jnp.bfloat16  # bf16-in / f32-accumulate matmuls


def _round_up(n, m):
    return ((n + m - 1) // m) * m


def _pad2d(a, rows, cols, value=0.0):
    r, c = a.shape
    return jnp.pad(a, ((0, rows - r), (0, cols - c)), constant_values=value)


def _softplus(x):
    # stable softplus: one exp + one log1p (EUP) per element
    return jnp.maximum(x, 0.0) + jnp.log1p(jnp.exp(-jnp.abs(x)))


def fused_mlp_bn_kernel(x_ref, w_ref, gamma_ref, beta_ref, wo_ref, bo_ref,
                        mu_ref, sigma_ref, h_ref,
                        *, true_batch, num_layers, half_p):
    """One grid step == one hidden layer; the output head runs at the last step.

    x_ref     : [B_pad, F]       bf16  (resident; constant block index)
    w_ref     : [1, F, F]        bf16  (streamed: layer l's weight)
    gamma_ref : [1, 1, F]        f32   (streamed)
    beta_ref  : [1, 1, F]        f32   (streamed)
    wo_ref    : [F, 2*half_p]    bf16  (resident)
    bo_ref    : [1, 2*half_p]    f32   (resident)
    mu_ref    : [B_pad, half_p]  f32   (written at last step only)
    sigma_ref : [B_pad, half_p]  f32
    h_ref     : [B_pad, F]       bf16  persistent VMEM scratch (carried activation)
    """
    l = pl.program_id(0)

    @pl.when(l == 0)
    def _():
        h_ref[...] = x_ref[...]

    # Valid-row mask: the batch is padded up to a full bf16 sublane tile, and
    # padded rows must not contribute to the BatchNorm batch statistics.
    b_pad = h_ref.shape[0]
    row_ids = jax.lax.broadcasted_iota(jnp.int32, (b_pad, 1), 0)
    mask = (row_ids < true_batch).astype(jnp.float32)            # [B_pad, 1]
    inv_b = 1.0 / float(true_batch)

    # Linear (hidden bias dropped: it cancels exactly under the BN mean-subtract).
    y = jnp.dot(h_ref[...], w_ref[0],
                preferred_element_type=jnp.float32)              # [B_pad, F] f32

    # Masked, two-pass BatchNorm1d training-mode statistics (biased variance).
    mean = jnp.sum(y * mask, axis=0, keepdims=True) * inv_b      # [1, F]
    centered = (y - mean) * mask
    var = jnp.sum(centered * centered, axis=0, keepdims=True) * inv_b

    # Fold gamma / rsqrt / mean / beta into one per-feature scale & shift.
    scale = gamma_ref[0] * jax.lax.rsqrt(var + BN_EPS)           # [1, F]
    shift = beta_ref[0] - mean * scale
    z = jnp.maximum(y * scale + shift, 0.0)                      # BN + ReLU, f32
    h_ref[...] = z.astype(h_ref.dtype)

    @pl.when(l == num_layers - 1)
    def _():
        # Merged output head: one [B_pad, 2*half_p] matmul, then 128-lane-aligned
        # value slices for the mu / sigma stores (no copy for the split).
        out = jnp.dot(z.astype(MXU_DTYPE), wo_ref[...],
                      preferred_element_type=jnp.float32) + bo_ref[...]
        mu_ref[...] = out[:, :half_p]
        sigma_ref[...] = _softplus(out[:, half_p:]) + SIGMA_EPS


def _vmem_budget_bytes(working_set_bytes):
    """Working set + headroom, capped at ~75% of the chip's physical VMEM."""
    try:
        cap = int(pltpu.get_tpu_info().vmem_capacity_bytes)
    except Exception:
        cap = 64 * 1024 * 1024   # assume v7x (most restrictive per-TC VMEM)
    return int(min(max(working_set_bytes + (4 << 20), 8 << 20), int(cap * 0.75)))


@functools.partial(jax.jit, static_argnums=(2,))
def mlp_with_bn_forward(x, packed, half):
    """x: [B, in_dim] f32; packed: output of pack_params()."""
    w_stack = packed["w_stack"]          # [L, F, F] bf16
    gamma_stack = packed["gamma_stack"]  # [L, 1, F] f32
    beta_stack = packed["beta_stack"]    # [L, 1, F] f32
    w_out = packed["w_out"]              # [F, 2*half_p] bf16
    b_out = packed["b_out"]              # [1, 2*half_p] f32

    L, F, _ = w_stack.shape
    half_p = w_out.shape[1] // 2

    B, _ = x.shape
    b_pad = _round_up(max(B, ROW_TILE), ROW_TILE)
    # Cast to bf16 in the wrapper: halves the activation DMA; it would be cast
    # before the MXU anyway, so no precision change.
    x_p = _pad2d(x, b_pad, F).astype(MXU_DTYPE)

    kernel = functools.partial(fused_mlp_bn_kernel, true_batch=B,
                               num_layers=L, half_p=half_p)

    # --- VMEM working-set estimate (double-buffered streamed blocks) ---------
    working_set = (2 * F * F * 2                      # streamed layer weight (bf16, x2)
                   + 2 * 2 * F * 4                    # gamma/beta blocks (f32, x2)
                   + 2 * b_pad * F * 2                # x (resident) + activation scratch
                   + 2 * F * 2 * half_p * 2           # head weight + buffering slack
                   + 2 * 2 * half_p * 4               # head bias
                   + 2 * 2 * b_pad * half_p * 4)      # two f32 outputs

    # --- advisory cost estimate ----------------------------------------------
    flops = int(2 * b_pad * (L * F * F + F * 2 * half_p))
    transcendentals = int(2 * b_pad * half_p + L * F)      # softplus + per-layer rsqrt
    bytes_accessed = int(x_p.size * 2 + w_stack.size * 2 + w_out.size * 2
                         + (gamma_stack.size + beta_stack.size + b_out.size) * 4
                         + 2 * b_pad * half_p * 4)

    grid_spec = pltpu.PrefetchScalarGridSpec(
        num_scalar_prefetch=0,
        grid=(L,),
        in_specs=[
            pl.BlockSpec((b_pad, F), lambda l: (0, 0)),          # x (resident)
            pl.BlockSpec((1, F, F), lambda l: (l, 0, 0)),        # layer weight (streamed)
            pl.BlockSpec((1, 1, F), lambda l: (l, 0, 0)),        # gamma (streamed)
            pl.BlockSpec((1, 1, F), lambda l: (l, 0, 0)),        # beta (streamed)
            pl.BlockSpec((F, 2 * half_p), lambda l: (0, 0)),     # head weight (resident)
            pl.BlockSpec((1, 2 * half_p), lambda l: (0, 0)),     # head bias (resident)
        ],
        out_specs=[
            pl.BlockSpec((b_pad, half_p), lambda l: (0, 0)),     # mu
            pl.BlockSpec((b_pad, half_p), lambda l: (0, 0)),     # sigma
        ],
        scratch_shapes=[pltpu.VMEM((b_pad, F), MXU_DTYPE)],      # carried activation
    )

    mu_p, sigma_p = pl.pallas_call(
        kernel,
        out_shape=(jax.ShapeDtypeStruct((b_pad, half_p), jnp.float32),
                   jax.ShapeDtypeStruct((b_pad, half_p), jnp.float32)),
        grid_spec=grid_spec,
        compiler_params=pltpu.CompilerParams(
            dimension_semantics=("arbitrary",),        # carried activation -> sequential
            vmem_limit_bytes=_vmem_budget_bytes(working_set)),
        cost_estimate=pl.CostEstimate(flops=flops,
                                      transcendentals=transcendentals,
                                      bytes_accessed=bytes_accessed),
    )(x_p, w_stack, gamma_stack, beta_stack, w_out, b_out)

    # Un-pad back to the true batch / half width.  (If half % 128 == 0 and the
    # consumer accepts padded rows, drop this slice to save an HBM round-trip.)
    return mu_p[:B, :half], sigma_p[:B, :half]


def init_params(key, in_dim, out_dim, hidden_dim):
    """Raw f32 params, PyTorch-Linear-like init; weights pre-transposed [F_in, F_out].

    Hidden Linear biases are intentionally not materialised: a per-feature bias
    added immediately before a training-mode BatchNorm cancels exactly when the
    batch mean is subtracted, so the forward output is unchanged.
    """
    raw = {"hidden": [], "out": None}
    h_in = in_dim
    for h_out in hidden_dim:
        key, kw = jax.random.split(key)
        bound = 1.0 / math.sqrt(h_in)
        w = jax.random.uniform(kw, (h_in, h_out), jnp.float32, -bound, bound)
        gamma = jnp.ones((1, h_out), jnp.float32)    # BatchNorm1d default affine
        beta = jnp.zeros((1, h_out), jnp.float32)
        raw["hidden"].append((w, gamma, beta))
        h_in = h_out
    key, kw, kb = jax.random.split(key, 3)
    bound = 1.0 / math.sqrt(h_in)
    w = jax.random.uniform(kw, (h_in, out_dim), jnp.float32, -bound, bound)
    b = jax.random.uniform(kb, (1, out_dim), jnp.float32, -bound, bound)
    raw["out"] = (w, b)
    return raw


def pack_params(raw, in_dim, out_dim):
    """Pad every feature dim to one common lane-aligned width F, stack the hidden
    layers along a leading layer axis (so they can be streamed one-per-grid-step),
    cast matmul weights to bf16, and reorder the head columns so the mu / sigma
    halves sit on a 128-lane boundary (zero-copy in-kernel split)."""
    half = out_dim // 2
    dims = [in_dim] + [w.shape[1] for (w, _, _) in raw["hidden"]]
    F = _round_up(max(dims), LANE)
    # TODO(synk): on v6e/v7x prefer F as a multiple of 256 for real model sizes
    # (256-wide MXU); 128 keeps padding waste low for these tiny demo dims.

    w_list, g_list, b_list = [], [], []
    for (w, gamma, beta) in raw["hidden"]:
        w_list.append(_pad2d(w, F, F).astype(MXU_DTYPE))
        g_list.append(_pad2d(gamma, 1, F, value=1.0))
        b_list.append(_pad2d(beta, 1, F, value=0.0))
    w_stack = jnp.stack(w_list, axis=0)                    # [L, F, F] bf16
    gamma_stack = jnp.stack(g_list, axis=0)                # [L, 1, F] f32
    beta_stack = jnp.stack(b_list, axis=0)                 # [L, 1, F] f32

    w, b = raw["out"]
    half_p = _round_up(half, LANE)
    w_out = jnp.concatenate([_pad2d(w[:, :half], F, half_p),
                             _pad2d(w[:, half:], F, half_p)],
                            axis=1).astype(MXU_DTYPE)      # [F, 2*half_p] bf16
    b_out = jnp.concatenate([_pad2d(b[:, :half], 1, half_p),
                             _pad2d(b[:, half:], 1, half_p)], axis=1)
    return {"w_stack": w_stack, "gamma_stack": gamma_stack, "beta_stack": beta_stack,
            "w_out": w_out, "b_out": b_out}


def reference_forward(x, raw):
    """Pure-JAX f32 reference of the same forward (correctness check)."""
    h = x
    for (w, gamma, beta) in raw["hidden"]:
        y = h @ w
        mean = jnp.mean(y, axis=0, keepdims=True)
        var = jnp.mean((y - mean) ** 2, axis=0, keepdims=True)
        h = jnp.maximum(gamma * (y - mean) * jax.lax.rsqrt(var + BN_EPS) + beta, 0.0)
    w, b = raw["out"]
    y = h @ w + b
    mu, ls = jnp.split(y, 2, axis=-1)
    return mu, jax.nn.softplus(ls) + SIGMA_EPS


if __name__ == "__main__":
    B, in_dim, out_dim = 8, 16, 8
    hidden_dim = [32, 32]

    key = jax.random.PRNGKey(0)
    key, kx, kp = jax.random.split(key, 3)
    x = jax.random.normal(kx, (B, in_dim), jnp.float32)

    raw = init_params(kp, in_dim, out_dim, hidden_dim)
    packed = pack_params(raw, in_dim, out_dim)

    mu, sigma = mlp_with_bn_forward(x, packed, out_dim // 2)
    jax.block_until_ready((mu, sigma))

    assert mu.shape == (B, out_dim // 2)
    assert sigma.shape == (B, out_dim // 2)
    assert bool(jnp.all(sigma > 0.0))

    # Correctness vs. pure-JAX f32 reference (bf16 MXU operands -> loose tol).
    mu_ref, sigma_ref = reference_forward(x, raw)
    assert bool(jnp.allclose(mu, mu_ref, atol=1e-1, rtol=1e-1))
    assert bool(jnp.allclose(sigma, sigma_ref, atol=1e-1, rtol=1e-1))

    print("KERNEL_OK")
</pallas_src>

<mosaic_0001>
module attributes {stable_mosaic.version = 11 : i64} {
  func.func @fused_mlp_bn_kernel(%arg0: i32, %arg1: memref<16x128xbf16, #tpu.memory_space<vmem>>, %arg2: memref<1x128x128xbf16, #tpu.memory_space<vmem>>, %arg3: memref<1x1x128xf32, #tpu.memory_space<vmem>>, %arg4: memref<1x1x128xf32, #tpu.memory_space<vmem>>, %arg5: memref<128x256xbf16, #tpu.memory_space<vmem>>, %arg6: memref<1x256xf32, #tpu.memory_space<vmem>>, %arg7: memref<16x128xf32, #tpu.memory_space<vmem>>, %arg8: memref<16x128xf32, #tpu.memory_space<vmem>>, %arg9: memref<16x128xbf16, #tpu.memory_space<vmem>>) attributes {dimension_semantics = [#tpu.dimension_semantics<arbitrary>], iteration_bounds = array<i64: 2>, scalar_prefetch = 0 : i64, scratch_operands = 1 : i64, tpu.core_type = #tpu.core_type<tc>, window_params = [{pipeline_mode = #tpu.pipeline_mode<synchronous>, transform_indices = @transform_0, window_bounds = array<i64: 16, 128>}, {transform_indices = @transform_1, window_bounds = array<i64: 1, 128, 128>}, {transform_indices = @transform_2, window_bounds = array<i64: 1, 1, 128>}, {transform_indices = @transform_3, window_bounds = array<i64: 1, 1, 128>}, {pipeline_mode = #tpu.pipeline_mode<synchronous>, transform_indices = @transform_4, window_bounds = array<i64: 128, 256>}, {pipeline_mode = #tpu.pipeline_mode<synchronous>, transform_indices = @transform_5, window_bounds = array<i64: 1, 256>}, {pipeline_mode = #tpu.pipeline_mode<synchronous>, transform_indices = @transform_6, window_bounds = array<i64: 16, 128>}, {pipeline_mode = #tpu.pipeline_mode<synchronous>, transform_indices = @transform_7, window_bounds = array<i64: 16, 128>}]} {
    %c0_i32 = arith.constant 0 : i32
    %0 = arith.cmpi eq, %arg0, %c0_i32 : i32
    %1 = arith.extui %0 : i1 to i32
    %c0_i32_0 = arith.constant 0 : i32
    %2 = arith.cmpi ne, %1, %c0_i32_0 : i32
    scf.if %2 {
      %c0_20 = arith.constant 0 : index
      %c0_21 = arith.constant 0 : index
      %48 = vector.load %arg1[%c0_20, %c0_21] : memref<16x128xbf16, #tpu.memory_space<vmem>>, vector<16x128xbf16>
      %c0_22 = arith.constant 0 : index
      %c0_23 = arith.constant 0 : index
      %49 = vector.load %arg9[%c0_22, %c0_23] : memref<16x128xbf16, #tpu.memory_space<vmem>>, vector<16x128xbf16>
      tpu.vector_store %arg9[%c0_22, %c0_23], %48 {strides = array<i32>} : memref<16x128xbf16, #tpu.memory_space<vmem>>, vector<16x128xbf16>,
    } else {
    }
    %3 = tpu.iota {dimensions = array<i32: 0>} : vector<16x1xi32>
    %c8_i32 = arith.constant 8 : i32
    %4 = vector.broadcast %c8_i32 : i32 to vector<16x1xi32>
    %5 = arith.cmpi slt, %3, %4 : vector<16x1xi32>
    %6 = arith.extui %5 : vector<16x1xi1> to vector<16x1xi32>
    %7 = arith.sitofp %6 : vector<16x1xi32> to vector<16x1xf32>
    %c0 = arith.constant 0 : index
    %c0_1 = arith.constant 0 : index
    %8 = vector.load %arg9[%c0, %c0_1] : memref<16x128xbf16, #tpu.memory_space<vmem>>, vector<16x128xbf16>
    %c0_2 = arith.constant 0 : index
    %c0_3 = arith.constant 0 : index
    %c0_4 = arith.constant 0 : index
    %9 = vector.load %arg2[%c0_2, %c0_3, %c0_4] : memref<1x128x128xbf16, #tpu.memory_space<vmem>>, vector<1x128x128xbf16>
    %10 = vector.shape_cast %9 : vector<1x128x128xbf16> to vector<128x128xbf16>
    %cst = arith.constant dense<0.000000e+00> : vector<16x128xf32>
    %11 = tpu.matmul %8, %10, %cst {dimension_numbers = #tpu.dot_dimension_numbers<[1], [0], [0], [1], [0, 0, 1, 1], [], []>} : vector<16x128xbf16>, vector<128x128xbf16>, vector<16x128xf32> -> vector<16x128xf32>
    %12 = vector.broadcast %7 : vector<16x1xf32> to vector<16x128xf32>
    %13 = arith.mulf %11, %12 : vector<16x128xf32>
    %cst_5 = arith.constant dense<0.000000e+00> : vector<128xf32>
    %14 = vector.multi_reduction <add>, %13, %cst_5 [0] : vector<16x128xf32> to vector<128xf32>
    %15 = vector.shape_cast %14 : vector<128xf32> to vector<1x128xf32>
    %cst_6 = arith.constant 1.250000e-01 : f32
    %16 = vector.broadcast %cst_6 : f32 to vector<1x128xf32>
    %17 = arith.mulf %15, %16 : vector<1x128xf32>
    %18 = vector.broadcast %17 : vector<1x128xf32> to vector<16x128xf32>
    %19 = arith.subf %11, %18 : vector<16x128xf32>
    %20 = vector.broadcast %7 : vector<16x1xf32> to vector<16x128xf32>
    %21 = arith.mulf %19, %20 : vector<16x128xf32>
    %22 = arith.mulf %21, %21 : vector<16x128xf32>
    %cst_7 = arith.constant dense<0.000000e+00> : vector<128xf32>
    %23 = vector.multi_reduction <add>, %22, %cst_7 [0] : vector<16x128xf32> to vector<128xf32>
    %24 = vector.shape_cast %23 : vector<128xf32> to vector<1x128xf32>
    %cst_8 = arith.constant 1.250000e-01 : f32
    %25 = vector.broadcast %cst_8 : f32 to vector<1x128xf32>
    %26 = arith.mulf %24, %25 : vector<1x128xf32>
    %c0_9 = arith.constant 0 : index
    %c0_10 = arith.constant 0 : index
    %c0_11 = arith.constant 0 : index
    %27 = vector.load %arg3[%c0_9, %c0_10, %c0_11] : memref<1x1x128xf32, #tpu.memory_space<vmem>>, vector<1x1x128xf32>
    %28 = vector.shape_cast %27 : vector<1x1x128xf32> to vector<1x128xf32>
    %cst_12 = arith.constant 9.99999974E-6 : f32
    %29 = vector.broadcast %cst_12 : f32 to vector<1x128xf32>
    %30 = arith.addf %26, %29 : vector<1x128xf32>
    %31 = math.rsqrt %30 : vector<1x128xf32>
    %32 = arith.mulf %28, %31 : vector<1x128xf32>
    %c0_13 = arith.constant 0 : index
    %c0_14 = arith.constant 0 : index
    %c0_15 = arith.constant 0 : index
    %33 = vector.load %arg4[%c0_13, %c0_14, %c0_15] : memref<1x1x128xf32, #tpu.memory_space<vmem>>, vector<1x1x128xf32>
    %34 = vector.shape_cast %33 : vector<1x1x128xf32> to vector<1x128xf32>
    %35 = arith.mulf %17, %32 : vector<1x128xf32>
    %36 = arith.subf %34, %35 : vector<1x128xf32>
    %37 = vector.broadcast %32 : vector<1x128xf32> to vector<16x128xf32>
    %38 = arith.mulf %11, %37 : vector<16x128xf32>
    %39 = vector.broadcast %36 : vector<1x128xf32> to vector<16x128xf32>
    %40 = arith.addf %38, %39 : vector<16x128xf32>
    %cst_16 = arith.constant 0.000000e+00 : f32
    %41 = vector.broadcast %cst_16 : f32 to vector<16x128xf32>
    %42 = arith.maximumf %40, %41 : vector<16x128xf32>
    %43 = arith.truncf %42 : vector<16x128xf32> to vector<16x128xbf16>
    %c0_17 = arith.constant 0 : index
    %c0_18 = arith.constant 0 : index
    %44 = vector.load %arg9[%c0_17, %c0_18] : memref<16x128xbf16, #tpu.memory_space<vmem>>, vector<16x128xbf16>
    tpu.vector_store %arg9[%c0_17, %c0_18], %43 {strides = array<i32>} : memref<16x128xbf16, #tpu.memory_space<vmem>>, vector<16x128xbf16>,
    %c1_i32 = arith.constant 1 : i32
    %45 = arith.cmpi eq, %arg0, %c1_i32 : i32
    %46 = arith.extui %45 : i1 to i32
    %c0_i32_19 = arith.constant 0 : i32
    %47 = arith.cmpi ne, %46, %c0_i32_19 : i32
    scf.if %47 {
      %48 = arith.truncf %42 : vector<16x128xf32> to vector<16x128xbf16>
      %c0_20 = arith.constant 0 : index
      %c0_21 = arith.constant 0 : index
      %49 = vector.load %arg5[%c0_20, %c0_21] : memref<128x256xbf16, #tpu.memory_space<vmem>>, vector<128x256xbf16>
      %cst_22 = arith.constant dense<0.000000e+00> : vector<16x256xf32>
      %50 = tpu.matmul %48, %49, %cst_22 {dimension_numbers = #tpu.dot_dimension_numbers<[1], [0], [0], [1], [0, 0, 1, 1], [], []>} : vector<16x128xbf16>, vector<128x256xbf16>, vector<16x256xf32> -> vector<16x256xf32>
      %c0_23 = arith.constant 0 : index
      %c0_24 = arith.constant 0 : index
      %51 = vector.load %arg6[%c0_23, %c0_24] : memref<1x256xf32, #tpu.memory_space<vmem>>, vector<1x256xf32>
      %52 = vector.broadcast %51 : vector<1x256xf32> to vector<16x256xf32>
      %53 = arith.addf %50, %52 : vector<16x256xf32>
      %54 = vector.extract_strided_slice %53 {offsets = [0, 0], sizes = [16, 128], strides = [1, 1]} : vector<16x256xf32> to vector<16x128xf32>
      %c0_25 = arith.constant 0 : index
      %c0_26 = arith.constant 0 : index
      %55 = vector.load %arg7[%c0_25, %c0_26] : memref<16x128xf32, #tpu.memory_space<vmem>>, vector<16x128xf32>
      tpu.vector_store %arg7[%c0_25, %c0_26], %54 {strides = array<i32>} : memref<16x128xf32, #tpu.memory_space<vmem>>, vector<16x128xf32>,
      %56 = vector.extract_strided_slice %53 {offsets = [0, 128], sizes = [16, 128], strides = [1, 1]} : vector<16x256xf32> to vector<16x128xf32>
      %cst_27 = arith.constant 0.000000e+00 : f32
      %57 = vector.broadcast %cst_27 : f32 to vector<16x128xf32>
      %58 = arith.maximumf %56, %57 : vector<16x128xf32>
      %59 = math.absf %56 : vector<16x128xf32>
      %cst_28 = arith.constant 0.000000e+00 : f32
      %60 = vector.broadcast %cst_28 : f32 to vector<16x128xf32>
      %61 = arith.subf %60, %59 : vector<16x128xf32>
      %62 = math.exp %61 : vector<16x128xf32>
      %63 = math.log1p %62 : vector<16x128xf32>
      %64 = arith.addf %58, %63 : vector<16x128xf32>
      %cst_29 = arith.constant 9.99999997E-7 : f32
      %65 = vector.broadcast %cst_29 : f32 to vector<16x128xf32>
      %66 = arith.addf %64, %65 : vector<16x128xf32>
      %c0_30 = arith.constant 0 : index
      %c0_31 = arith.constant 0 : index
      %67 = vector.load %arg8[%c0_30, %c0_31] : memref<16x128xf32, #tpu.memory_space<vmem>>, vector<16x128xf32>
      tpu.vector_store %arg8[%c0_30, %c0_31], %66 {strides = array<i32>} : memref<16x128xf32, #tpu.memory_space<vmem>>, vector<16x128xf32>,
    } else {
    }
    return
  }
  func.func @transform_0(%arg0: i32) -> (i32, i32) {
    %c0_i32 = arith.constant 0 : i32
    %c0_i32_0 = arith.constant 0 : i32
    %c0_i32_1 = arith.constant 0 : i32
    return %c0_i32, %c0_i32_0 : i32, i32
  }
  func.func @transform_1(%arg0: i32) -> (i32, i32, i32) {
    %c0_i32 = arith.constant 0 : i32
    %c0_i32_0 = arith.constant 0 : i32
    %c0_i32_1 = arith.constant 0 : i32
    return %arg0, %c0_i32, %c0_i32_0 : i32, i32, i32
  }
  func.func @transform_2(%arg0: i32) -> (i32, i32, i32) {
    %c0_i32 = arith.constant 0 : i32
    %c0_i32_0 = arith.constant 0 : i32
    %c0_i32_1 = arith.constant 0 : i32
    return %arg0, %c0_i32, %c0_i32_0 : i32, i32, i32
  }
  func.func @transform_3(%arg0: i32) -> (i32, i32, i32) {
    %c0_i32 = arith.constant 0 : i32
    %c0_i32_0 = arith.constant 0 : i32
    %c0_i32_1 = arith.constant 0 : i32
    return %arg0, %c0_i32, %c0_i32_0 : i32, i32, i32
  }
  func.func @transform_4(%arg0: i32) -> (i32, i32) {
    %c0_i32 = arith.constant 0 : i32
    %c0_i32_0 = arith.constant 0 : i32
    %c0_i32_1 = arith.constant 0 : i32
    return %c0_i32, %c0_i32_0 : i32, i32
  }
  func.func @transform_5(%arg0: i32) -> (i32, i32) {
    %c0_i32 = arith.constant 0 : i32
    %c0_i32_0 = arith.constant 0 : i32
    %c0_i32_1 = arith.constant 0 : i32
    return %c0_i32, %c0_i32_0 : i32, i32
  }
  func.func @transform_6(%arg0: i32) -> (i32, i32) {
    %c0_i32 = arith.constant 0 : i32
    %c0_i32_0 = arith.constant 0 : i32
    %c0_i32_1 = arith.constant 0 : i32
    return %c0_i32, %c0_i32_0 : i32, i32
  }
  func.func @transform_7(%arg0: i32) -> (i32, i32) {
    %c0_i32 = arith.constant 0 : i32
    %c0_i32_0 = arith.constant 0 : i32
    %c0_i32_1 = arith.constant 0 : i32
    return %c0_i32, %c0_i32_0 : i32, i32
  }
}

</mosaic_0001>

<bundles_post_ra>
// kernel: mlp_with_bn_forward.1
= control target key start
LH: loop header
LB: loop body
LE: loop exit
PB: predicated region body
PF: predicated region fallthrough
CT: control target
= control target key end

     0   :  { %13 = vsyncpa [#allocation4], 0  ;;  %s1233_s0 = inlined_call_operand.vmem [shape: bf16[16,128], index: 0, kind: input, shape index: {}]   ;;  %s1234_s1 = inlined_call_operand.hbm [shape: bf16[2,128,128], index: 1, kind: input, shape index: {}]   ;;  %s1235_s2 = inlined_call_operand.vmem [shape: f32[2,1,128], index: 2, kind: input, shape index: {}]   ;;  %s1236_s3 = inlined_call_operand.vmem [shape: f32[2,1,128], index: 3, kind: input, shape index: {}]   ;;  %s1237_s4 = inlined_call_operand.hbm [shape: bf16[128,256], index: 4, kind: input, shape index: {}]   ;;  %s1238_s5 = inlined_call_operand.vmem [shape: f32[1,256], index: 5, kind: input, shape index: {}]   ;;  %s1239_s6 = inlined_call_operand.vmem [shape: f32[16,128], index: 6, kind: output, shape index: {0}]   ;;  %s1240_s7 = inlined_call_operand.vmem [shape: f32[16,128], index: 7, kind: output, shape index: {1}]  }
   0x1   :  { %15 = vsyncpa [#allocation4 + $0x1], 0 }
   0x2   :  { %16 = vsyncpa [#allocation6], 0  ;;  %s1091_s24 = smov 0   ;;  %s1093_s25 = smov 0  }
   0x3   :  { %s1095_s26 = smov 0   ;;  %s1097_s27 = smov 0  }
   0x4 LB: > { %s1110_s28 = sadd.s32 4294967295, %s1044_s27   ;;  %p63_p0 = scmp.ne.s32.totalorder %s1036_s25, %s1032_s24  ;;  %s1044_s27 = sphi %s1097_s27, %s1247_s27   ;;  %s1040_s26 = sphi %s1095_s26, %s1246_s26   ;;  %s1036_s25 = sphi %s1093_s25, %s1245_s25   ;;  %s1032_s24 = sphi %s1091_s24, %s1244_s24  }
   0x5   : > { %p64_p1 = scmp.eq.s32.totalorder %s1110_s28, 0  ;;  %p738_p2 = scmp.ge.s32.totalorder %s1044_s27, 1 }
   0x6   : > { %p210_p3 = scmp.lt.s32.totalorder %s1044_s27, 3  ;;  %p739_p4 = scmp.ne.s32.totalorder %s1110_s28, 0 }
   0x7   : > { %p1119_p5 = por %p64_p1, %p63_p0  ;;  %s224_s9 = sshll.u32 %s1237_s4, 4  ;;  %s225_s9 = int_to_ptr.hbm [resolvable:$true] %s224_s9 }
   0x8   : > { %p1126_p6 = pnand %p738_p2, %p210_p3  ;;  %s1046_s11 = smov [#allocation5]  }
   0x9   : > { %s226_s12 = sshll.u32 %s1046_s11, 4  ;;  %s1135_s13 = sadd.s32 1, %s1044_s27   ;;  %s227_s12 = int_to_ptr.vmem [resolvable:$true] %s226_s12 }
   0xa   : > { %p888_p7 = pneg %p1126_p6  ;;  %s1047_s14 = smov 128  }
   0xb   : > { %s1048_s15 = smov 8   ;;  %s47_s16 = ssub.s32 %s1044_s27, %s1135_s13 }
   0xc   : > { %p889_p8 = pnand %p888_p7, %p64_p1  ;;  %s50_s17 = sadd.s32 1, %s1040_s26 }
   0xd   : > { %p48_p9 = scmp.eq.s32.totalorder %s47_s16, 0  ;;  %p57_p10 = scmp.ne.s32.totalorder %s1040_s26, %s1036_s25 }
   0xe   : > { %891 = dma.hbm_to_vmem [thread:$0]  (!%p889_p8), %s225_s9, 2048, %s227_s12, [#allocation6], %s1047_s14, %s1047_s14, %s1048_s15  }
   0xf   : > { %p58_p11 = scmp.eq.s32.totalorder %s1044_s27, 0  ;;  %p897_p12 = scmp.lt.s32.totalorder %s1044_s27, 2 }
  0x10   : > { %s1145_s18 = scalar_select %p48_p9, %s1040_s26, %s50_s17  }
  0x11   : > { %p59_p13 = por %p58_p11, %p57_p10  ;;  %s243_s19 = sand.u32 1, %s1040_s26  }
  0x12   : > { %s741_s20 = sshll.u32 %s243_s19, 6  ;;  %s851_s21 = sshll.u32 %s1044_s27, 6 }
  0x13   : > { %s252_s24 = scalar_lea.hbm %s1234_s1, %s851_s21  ;;  %s247_s30 = scalar_lea.vmem [#allocation3], %s741_s20 }
  0x14   : > { %s255_s8 = sshll.u32 %s247_s30, 4  ;;  %s253_s11 = sshll.u32 %s252_s24, 4  ;;  %s256_s8 = int_to_ptr.vmem [resolvable:$true] %s255_s8  ;;  %s254_s11 = int_to_ptr.hbm [resolvable:$true] %s253_s11 }
  0x15   : > { %p1152_p0 = pnand %p897_p12, %p59_p13  ;;  %s244_s12 = scalar_lea.sflag [#allocation4], %s243_s19 }
  0x16   : > { %s976_s14 = sshra.s32 %s254_s11, 4  ;;  %s983_s17 = scalar_lea.hbm %s1234_s1, 128  ;;  %s977_s14 = int_to_ptr.hbm [resolvable:$true] %s976_s14 }
  0x17   : > { %s978_s15 = scalar_lea.hbm %s977_s14, 64  ;;  %p980_p3 = pneg %p1152_p0 }
  0x18   : > { %p979_p2 = scmp.ne.s32.totalorder %s977_s14, %s978_s15  ;;  %p984_p9 = scmp.lt.s32.totalorder %s977_s14, %s1234_s1 }
  0x19   : > { %p985_p10 = scmp.lt.s32.totalorder %s983_s17, %s978_s15 }
  0x1a   : > { %p981_p7 = pnand %p980_p3, %p979_p2 }
  0x1b   : > { %p986_p11 = por %p985_p10, %p984_p9 }
  0x1c   : > { %p982_p8 = pneg %p981_p7 }
  0x1e   : > { %p987_p12 = pnand %p986_p11, %p982_p8 }
  0x20   : > { %990 = shalt.err (!%p987_p12)
}
  0x21   : > { %s1049_s19 = smov 64   ;;  %s1050_s22 = smov 4  }
  0x22   : > { %895 = dma.hbm_to_vmem [thread:$0]  (!%p1152_p0), %s254_s11, 1024, %s256_s8, %s244_s12, %s1049_s19, %s1049_s19, %s1050_s22  }
  0x23   : > { %279 = sbr.rel (%p1126_p6) target bundleno = 491 (0x1eb), region = 44  ;;  %s281_s23 = sand.u32 (!%p1126_p6), 1, %s1036_s25  }
  0x24   : > { %s745_s24 = sshll.u32 (!%p1126_p6), %s281_s23, 6  ;;  %s282_s30 = scalar_lea.sflag (!%p1126_p6), [#allocation4], %s281_s23 }
  0x25   : > { %s285_s27 = scalar_lea.vmem (!%p1126_p6), [#allocation3], %s745_s24 }
  0x28   : > { %1023 = dma.done.wait (%p1119_p5), %s282_s30, 1024  }
  0x29   : > { %1025 = vsyncadd (%p1119_p5), %s282_s30, 4294966272 }
  0x2a   : > { %1027 = dma.done.wait (%p64_p1), [#allocation6], 2048  }
  0x2b   : > { %1029 = vsyncadd (%p64_p1), [#allocation6], 4294965248  ;;  %p323_p6 = scmp.lt.s32.totalorder %s1110_s28, 1  ;;  %332 = sbr.rel (%p739_p4) target bundleno = 50 (0x32), region = 56 }
  0x2d   : > { %s1179_s10 = scalar_select %p323_p6, %s1110_s28, 1 }
  0x2f   : > { %s325_s9 = scalar_lea.vmem %s1235_s2, %s1179_s10  ;;  %s328_s14 = scalar_lea.vmem %s1236_s3, %s1179_s10 }
  0x30   : > { %v333_v0 = vld [vmem:[%s1233_s0] sm:$0xff]  }
  0x31   : > { %335 = vst [vmem:[#allocation2] sm:$0xff] %v333_v0  }
  0x32 PF: > { %v860_v1 = vld [vmem:[%s285_s27 + $0x38] sm:$0xff]  ;;  %v859_v2 = vld [vmem:[%s285_s27 + $0x30] sm:$0xff]  ;;  %v858_v3 = vld [vmem:[%s285_s27 + $0x28] sm:$0xff]  ;;  %p784_p1 = scmp.ne.s32.totalorder %s1110_s28, 1 }
  0x33   : > { %418 = vmatpush.bf16.msra.mxu0 %v860_v1  ;;  %v857_v4 = vld [vmem:[%s285_s27 + $0x20] sm:$0xff]  ;;  %v856_v5 = vld [vmem:[%s285_s27 + $0x18] sm:$0xff]  ;;  %v855_v6 = vld [vmem:[%s285_s27 + $0x10] sm:$0xff] }
  0x34   : > { %v854_v7 = vld [vmem:[%s285_s27 + $0x8] sm:$0xff]  ;;  %v853_v8 = vld [vmem:[%s285_s27] sm:$0xff]  ;;  %v456_v40 = vld [vmem:[%s325_s9] sm:$0x1] }
  0x35   : > { %v469_v44 = vld [vmem:[%s328_s14] sm:$0x1] }
  0x37   : > { %419 = vmatpush.bf16.msra.mxu0 %v859_v2 }
  0x38   : > { %v852_v9 = vld [vmem:[#allocation2] sm:$0xff] }
  0x3b   : > { %420 = vmatpush.bf16.msra.mxu0 %v858_v3 }
  0x3f   : > { %421 = vmatpush.bf16.msra.mxu0 %v857_v4 }
  0x43   : > { %422 = vmatpush.bf16.msra.mxu0 %v856_v5 }
  0x47   : > { %423 = vmatpush.bf16.msra.mxu0 %v855_v6 }
  0x4b   : > { %424 = vmatpush.bf16.msra.mxu0 %v854_v7 }
  0x4f   : > { %425 = vmatpush.bf16.msra.mxu0 %v853_v8 }
  0x52   : > { %426 = vmatmul.bf16.vlgmr.msra.gmra.mxu0 %v852_v9 }
  0xcf   : > { %v427_v10 = vpop.f32.mrf.mxu0 }
  0xd7   : > { %v429_v11 = vpop.f32.mrf.mxu0 }
  0xd8   : > { %v433_v12 = vmul.f32 0.0, %v429_v11 }
  0xda   : > { %v434_v13 = vadd.f32 %v433_v12, %v427_v10 }
  0xdc   : > { %v435_v14 = vrot.slane %v434_v13, 4 }
  0xde   : > { %v436_v15 = vadd.f32 %v435_v14, %v434_v13 }
  0xe0   : > { %v437_v16 = vrot.slane %v436_v15, 2 }
  0xe2   : > { %v438_v17 = vadd.f32 %v437_v16, %v436_v15 }
  0xe4   : > { %v439_v18 = vrot.slane %v438_v17, 1 }
  0xe6   : > { %v440_v19 = vadd.f32 %v439_v18, %v438_v17 }
  0xe8   : > { %v441_v20 = vmul.f32 0.125, %v440_v19 }
  0xea   : > { %v442_v21 = vsub.f32 %v427_v10, %v441_v20  ;;  %v443_v22 = vsub.f32 %v429_v11, %v441_v20 }
  0xec   : > { %v445_v23 = vmul.f32 0.0, %v443_v22  ;;  %v446_v24 = vmul.f32 %v442_v21, %v442_v21 }
  0xee   : > { %v447_v25 = vmul.f32 %v445_v23, %v445_v23 }
  0xf0   : > { %v448_v26 = vadd.f32 %v447_v25, %v446_v24 }
  0xf2   : > { %v449_v27 = vrot.slane %v448_v26, 4 }
  0xf4   : > { %v450_v28 = vadd.f32 %v449_v27, %v448_v26 }
  0xf6   : > { %v451_v29 = vrot.slane %v450_v28, 2 }
  0xf8   : > { %v452_v30 = vadd.f32 %v451_v29, %v450_v28 }
  0xfa   : > { %v453_v31 = vrot.slane %v452_v30, 1 }
  0xfc   : > { %v454_v32 = vadd.f32 %v453_v31, %v452_v30 }
  0xfe   : > { %v455_v33 = vmul.f32 0.125, %v454_v32 }
 0x100   : > { %v457_v34 = vadd.f32 1e-05, %v455_v33 }
 0x102   : > { %936 = vrsqrt.f32 %v457_v34  ;;  %vm464_vm1 = vweird.f32 %v457_v34 }
 0x108   : > { %v937_v35 = vpop.eup %936 }
 0x109   : > { %v459_v36 = vmul.f32 %v937_v35, %v457_v34  ;;  %vm465_vm0 = vweird.f32 %v937_v35 }
 0x10a   : > { %vm466_vm2 = vmor %vm464_vm1, %vm465_vm0 }
 0x10b   : > { %v460_v37 = vmul.f32 %v937_v35, %v459_v36 }
 0x10d   : > { %v461_v38 = vmul.f32 0.5, %v460_v37 }
 0x10f   : > { %v462_v39 = vsub.f32 1.5, %v461_v38 }
 0x111   : > { %v463_v41 = vmul.f32 %v937_v35, %v462_v39 }
 0x113   : > { %v467_v42 = vsel %vm466_vm2, %v937_v35, %v463_v41 }
 0x114   : > { %v468_v43 = vmul.f32 %v467_v42, %v456_v40 }
 0x116   : > { %v470_v45 = vmul.f32 %v468_v43, %v441_v20  ;;  %v473_v46 = vperm.slane %v468_v43, 0 }
 0x118   : > { %v471_v47 = vsub.f32 %v469_v44, %v470_v45  ;;  %v475_v48 = vmul.f32 %v473_v46, %v427_v10  ;;  %v476_v49 = vmul.f32 %v473_v46, %v429_v11 }
 0x11a   : > { %v478_v50 = vperm.slane %v471_v47, 0 }
 0x11c   : > { %v480_v51 = vadd.f32 %v478_v50, %v475_v48  ;;  %v481_v52 = vadd.f32 %v478_v50, %v476_v49 }
 0x11e   : > { %v482_v53 = vmax.f32 %v480_v51, 0.0  ;;  %v483_v54 = vmax.f32 %v481_v52, 0.0  ;;  %491 = sbr.rel (%p784_p1) target bundleno = 491 (0x1eb), region = 60 }
 0x120   : > { %v484_v55 = vpack.c.bf16 %v482_v53, %v482_v53  ;;  %v485_v56 = vpack.c.bf16 %v483_v54, %v483_v54  ;;  %v880_v57 = vpack.c.bf16 %v483_v54, %v482_v53 }
 0x122   : > { %881 = vst [vmem:[#allocation2] sm:$0xff] %v880_v57  }
 0x123   : > { %v875_v58 = vld [vmem:[#allocation5 + $0x74] sm:$0xf]  ;;  %v845_v59 = vld [vmem:[#allocation5 + $0x78] sm:$0xf0]  ;;  %v873_v60 = vld [vmem:[#allocation5 + $0x64] sm:$0xf]  ;;  %v516_v37 = vunpack.c.l.b16 %v484_v55  ;;  %v517_v38 = vunpack.c.l.b16 %v485_v56 }
 0x124   : > { %v848_v61 = vor.u32 %v875_v58, %v845_v59  ;;  %v837_v62 = vld [vmem:[#allocation5 + $0x68] sm:$0xf0]  ;;  %v871_v0 = vld [vmem:[#allocation5 + $0x54] sm:$0xf]  ;;  %v829_v1 = vld [vmem:[#allocation5 + $0x58] sm:$0xf0] }
 0x125   : > { %v840_v63 = vor.u32 %v873_v60, %v837_v62  ;;  %v843_v2 = vld [vmem:[#allocation5 + $0x70] sm:$0xf]  ;;  %v876_v3 = vld [vmem:[#allocation5 + $0x74] sm:$0xf0]  ;;  %v835_v5 = vld [vmem:[#allocation5 + $0x60] sm:$0xf]  ;;  %v832_v7 = vor.u32 %v871_v0, %v829_v1  ;;  %v518_v43 = vpack.c.b16 %v517_v38, %v516_v37 }
 0x126   : > { %614 = vmatpush.bf16.msra.mxu1 %v848_v61  ;;  %v844_v4 = vor.u32 %v876_v3, %v843_v2  ;;  %v874_v6 = vld [vmem:[#allocation5 + $0x64] sm:$0xf0]  ;;  %v869_v8 = vld [vmem:[#allocation5 + $0x44] sm:$0xf]  ;;  %v821_v10 = vld [vmem:[#allocation5 + $0x48] sm:$0xf0] }
 0x127   : > { %v836_v9 = vor.u32 %v874_v6, %v835_v5  ;;  %v827_v11 = vld [vmem:[#allocation5 + $0x50] sm:$0xf]  ;;  %v872_v12 = vld [vmem:[#allocation5 + $0x54] sm:$0xf0]  ;;  %v824_v13 = vor.u32 %v869_v8, %v821_v10  ;;  %v867_v14 = vld [vmem:[#allocation5 + $0x34] sm:$0xf] }
 0x128   : > { %600 = vmatpush.bf16.msra.mxu0 %v844_v4  ;;  %v828_v15 = vor.u32 %v872_v12, %v827_v11  ;;  %v813_v16 = vld [vmem:[#allocation5 + $0x38] sm:$0xf0]  ;;  %v819_v17 = vld [vmem:[#allocation5 + $0x40] sm:$0xf]  ;;  %v870_v18 = vld [vmem:[#allocation5 + $0x44] sm:$0xf0] }
 0x129   : > { %v816_v19 = vor.u32 %v867_v14, %v813_v16  ;;  %v865_v20 = vld [vmem:[#allocation5 + $0x24] sm:$0xf]  ;;  %v820_v21 = vor.u32 %v870_v18, %v819_v17  ;;  %v805_v22 = vld [vmem:[#allocation5 + $0x28] sm:$0xf0]  ;;  %v811_v23 = vld [vmem:[#allocation5 + $0x30] sm:$0xf] }
 0x12a   : > { %615 = vmatpush.bf16.msra.mxu1 %v840_v63  ;;  %v868_v24 = vld [vmem:[#allocation5 + $0x34] sm:$0xf0]  ;;  %v808_v25 = vor.u32 %v865_v20, %v805_v22  ;;  %v863_v26 = vld [vmem:[#allocation5 + $0x14] sm:$0xf]  ;;  %v797_v28 = vld [vmem:[#allocation5 + $0x18] sm:$0xf0] }
 0x12b   : > { %v812_v27 = vor.u32 %v868_v24, %v811_v23  ;;  %v803_v29 = vld [vmem:[#allocation5 + $0x20] sm:$0xf]  ;;  %v866_v30 = vld [vmem:[#allocation5 + $0x24] sm:$0xf0]  ;;  %v800_v31 = vor.u32 %v863_v26, %v797_v28  ;;  %v861_v32 = vld [vmem:[#allocation5 + $0x4] sm:$0xf] }
 0x12c   : > { %601 = vmatpush.bf16.msra.mxu0 %v836_v9  ;;  %v804_v33 = vor.u32 %v866_v30, %v803_v29  ;;  %v789_v34 = vld [vmem:[#allocation5 + $0x8] sm:$0xf0]  ;;  %v795_v35 = vld [vmem:[#allocation5 + $0x10] sm:$0xf]  ;;  %v864_v36 = vld [vmem:[#allocation5 + $0x14] sm:$0xf0] }
 0x12d   : > { %v792_v39 = vor.u32 %v861_v32, %v789_v34  ;;  %v796_v40 = vor.u32 %v864_v36, %v795_v35  ;;  %v787_v41 = vld [vmem:[#allocation5] sm:$0xf]  ;;  %v862_v42 = vld [vmem:[#allocation5 + $0x4] sm:$0xf0]  ;;  %v508_v45 = vld [vmem:[%s1238_s5] sm:$0x3] }
 0x12e   : > { %616 = vmatpush.bf16.msra.mxu1 %v832_v7  ;;  %v788_v44 = vor.u32 %v862_v42, %v787_v41  ;;  %v511_v46 = vperm.slane %v508_v45, 1  ;;  %v510_v49 = vperm.slane %v508_v45, 0 }
 0x130   : > { %602 = vmatpush.bf16.msra.mxu0 %v828_v15 }
 0x132   : > { %617 = vmatpush.bf16.msra.mxu1 %v824_v13 }
 0x134   : > { %603 = vmatpush.bf16.msra.mxu0 %v820_v21 }
 0x136   : > { %618 = vmatpush.bf16.msra.mxu1 %v816_v19 }
 0x138   : > { %604 = vmatpush.bf16.msra.mxu0 %v812_v27 }
 0x13a   : > { %619 = vmatpush.bf16.msra.mxu1 %v808_v25 }
 0x13c   : > { %605 = vmatpush.bf16.msra.mxu0 %v804_v33 }
 0x13e   : > { %620 = vmatpush.bf16.msra.mxu1 %v800_v31 }
 0x140   : > { %606 = vmatpush.bf16.msra.mxu0 %v796_v40 }
 0x142   : > { %621 = vmatpush.bf16.msra.mxu1 %v792_v39 }
 0x144   : > { %607 = vmatpush.bf16.msra.mxu0 %v788_v44 }
 0x145   : > { %622 = vmatmul.bf16.vlgmr.msra.gmra.mxu1 %v518_v43 }
 0x147   : > { %608 = vmatmul.bf16.vlgmr.msra.gmra.mxu0 %v518_v43 }
 0x1c2   : > { %v623_v47 = vpop.f32.mrf.mxu1 }
 0x1c3   : > { %v624_v48 = vadd.f32 %v623_v47, %v511_v46 }
 0x1c4   : > { %v609_v51 = vpop.f32.mrf.mxu0 }
 0x1c5   : > { %v632_v50 = vand.u32 2147483647, %v624_v48  ;;  %v610_v53 = vadd.f32 %v609_v51, %v510_v49  ;;  %v630_v9 = vmax.f32 %v624_v48, 0.0 }
 0x1c7   : > { %v634_v52 = vsub.f32 0.0, %v632_v50  ;;  %628 = vst [vmem:[%s1239_s6] sm:$0xff] %v610_v53 }
 0x1c9   : > { %v636_v54 = vmul.f32 1.442695, %v634_v52 }
 0x1ca   : > { %v625_v55 = vpop.f32.mrf.mxu1 }
 0x1cb   : > { %938 = vpow2.f32 %v636_v54  ;;  %v626_v56 = vadd.f32 %v625_v55, %v511_v46 }
 0x1cc   : > { %v611_v58 = vpop.f32.mrf.mxu0 }
 0x1cd   : > { %v633_v57 = vand.u32 2147483647, %v626_v56  ;;  %v612_v60 = vadd.f32 %v611_v58, %v510_v49  ;;  %v631_v18 = vmax.f32 %v626_v56, 0.0 }
 0x1cf   : > { %v635_v59 = vsub.f32 0.0, %v633_v57  ;;  %629 = vst [vmem:[%s1239_s6 + $0x8] sm:$0xff] %v612_v60 }
 0x1d1   : > { %v939_v61 = vpop.eup %938  ;;  %v638_v62 = vmul.f32 1.442695, %v635_v59 }
 0x1d2   : > { %v640_v63 = vadd.f32 1.0, %v939_v61  ;;  %v643_v0 = vmul.f32 -0.5, %v939_v61  ;;  %v646_v2 = vand.u32 2147483647, %v939_v61 }
 0x1d3   : > { %940 = vpow2.f32 %v638_v62 }
 0x1d4   : > { %942 = vlog2.f32 %v640_v63  ;;  %v644_v1 = vadd.f32 1.0, %v643_v0  ;;  %vm647_vm3 = vcmp.lt.f32.partialorder %v646_v2, 0.0004427343 }
 0x1d6   : > { %v645_v7 = vmul.f32 %v939_v61, %v644_v1 }
 0x1d9   : > { %v941_v3 = vpop.eup %940 }
 0x1da   : > { %v943_v4 = vpop.eup %942  ;;  %v649_v5 = vadd.f32 1.0, %v941_v3  ;;  %v652_v8 = vmul.f32 -0.5, %v941_v3  ;;  %v655_v14 = vand.u32 2147483647, %v941_v3 }
 0x1db   : > { %v642_v6 = vmul.f32 0.6931472, %v943_v4 }
 0x1dc   : > { %944 = vlog2.f32 %v649_v5  ;;  %v653_v12 = vadd.f32 1.0, %v652_v8  ;;  %vm656_vm4 = vcmp.lt.f32.partialorder %v655_v14, 0.0004427343 }
 0x1dd   : > { %v648_v10 = vsel %vm647_vm3, %v645_v7, %v642_v6 }
 0x1de   : > { %v658_v11 = vadd.f32 %v648_v10, %v630_v9  ;;  %v654_v17 = vmul.f32 %v941_v3, %v653_v12 }
 0x1e0   : > { %v660_v13 = vadd.f32 1e-06, %v658_v11 }
 0x1e2   : > { %v945_v15 = vpop.eup %944  ;;  %662 = vst [vmem:[%s1240_s7] sm:$0xff] %v660_v13 }
 0x1e3   : > { %v651_v16 = vmul.f32 0.6931472, %v945_v15 }
 0x1e5   : > { %v657_v19 = vsel %vm656_vm4, %v654_v17, %v651_v16 }
 0x1e6   : > { %v659_v20 = vadd.f32 %v657_v19, %v631_v18 }
 0x1e8   : > { %v661_v21 = vadd.f32 1e-06, %v659_v20 }
 0x1ea   : > { %663 = vst [vmem:[%s1240_s7 + $0x8] sm:$0xff] %v661_v21 }
 0x1eb PF: > { %p19_p4 = scmp.ge.s32.totalorder %s1135_s13, 4   ;;  %s1244_s24 = smov %s1036_s25 }
 0x1ec   : > { %s1245_s25 = smov %s1040_s26  ;;  %s1246_s26 = smov %s1145_s18 }
 0x1ed   : > { %s1247_s27 = smov %s1135_s13  ;;  %21 = sbr.rel (!%p19_p4) target bundleno = 4 (0x4), region = 106 }
 0x1f2   :  { %681 = vsyncpa [#allocation4], 1 }
 0x1f3   :  { %683 = vsyncpa [#allocation4 + $0x1], 1 }
 0x1f4   :  { %684 = vsyncpa [#allocation6], 1 }

</bundles_post_ra>
